<compile_context>
chip_gen: v6e
topology: v6e:2x2x1
jax: 0.10.0
libtpu: 0.0.40
codegen_flags: <defaults>
</compile_context>

<pallas_src>
import functools

import jax
import jax.numpy as jnp
from jax.experimental import pallas as pl
from jax.experimental.pallas import tpu as pltpu

LANE = 128      # f32 lane width
SUBLANE = 8     # f32 sublane width


def _round_up(n, m):
    return ((n + m - 1) // m) * m


def _pick_batch_tiling(batch):
    """Pick (m_pad, tm): big tiles to amortize per-grid-step overhead, but
    keep >= 2 grid steps when the batch allows it (both v7x TCs busy)."""
    tm_cap = 512
    if batch > tm_cap:
        tm = tm_cap
        m_pad = _round_up(batch, tm)
    elif batch >= 2 * SUBLANE:
        tm = _round_up((batch + 1) // 2, SUBLANE)
        m_pad = 2 * tm
    else:
        tm = _round_up(max(batch, 1), SUBLANE)
        m_pad = tm
    return m_pad, tm


def _fused_mlp_kernel(x_ref, *refs, num_layers):
    """Fused MLP body.

    refs = (w0, b0, w1, b1, ..., w_{L-1}, b_{L-1}, o_ref)
    x_ref: (tm, D0) f32   w_l: (D_l, D_{l+1}) bf16   b_l: (1, D_{l+1}) f32
    o_ref: (tm, D_L) f32.
    Activations stay on-chip; MXU sees bf16 operands, accumulates f32.
    """
    o_ref = refs[-1]
    h = x_ref[...]                                   # f32
    for l in range(num_layers):
        w = refs[2 * l][...]                         # bf16 (pre-cast once)
        b = refs[2 * l + 1][...]                     # f32
        h = jnp.dot(h.astype(jnp.bfloat16), w,
                    preferred_element_type=jnp.float32) + b
        if l < num_layers - 1:
            h = jnp.maximum(h, 0.0)                  # f32 epilogue (v5e-safe)
    o_ref[...] = h.astype(o_ref.dtype)


def prepare_params(params, lane_align=LANE):
    """One-time parameter preparation (hoisted out of the forward hot path).

    * First-layer K is kept at the logical in_dim (full-dim block is legal).
    * Hidden/output feature dims zero-padded to `lane_align` (128; use 256 for
      production widths on v6e/v7x).
    * Weights cast to bf16 once; biases stay f32, shape (1, N_padded).
    """
    dims = [params[0][0].shape[0]] + [w.shape[1] for (w, _) in params]
    pdims = [dims[0]] + [_round_up(d, lane_align) for d in dims[1:]]
    weights, biases = [], []
    for (w, b), kp, np_ in zip(params, pdims[:-1], pdims[1:]):
        K, N = w.shape
        wp = (jnp.zeros((kp, np_), jnp.float32).at[:K, :N].set(w)
              .astype(jnp.bfloat16))
        bp = jnp.zeros((1, np_), jnp.float32).at[0, :N].set(b)
        weights.append(wp)
        biases.append(bp)
    return {"dims": dims, "pdims": pdims, "weights": weights, "biases": biases}


def mynet_forward(x, prepared):
    """Forward pass matching MyNet.forward: ReLU after every layer but the last.

    One fused pallas_call over the whole network, tiled along the batch axis.
    Expects `prepared = prepare_params(params)` (padding done once, not here).
    """
    batch, in_dim = x.shape
    dims, pdims = prepared["dims"], prepared["pdims"]
    weights, biases = prepared["weights"], prepared["biases"]
    num_layers = len(weights)
    assert num_layers >= 1 and in_dim == dims[0]

    m_pad, tm = _pick_batch_tiling(batch)
    # Zero-copy when the batch already matches; otherwise pad rows only.
    if m_pad == batch:
        x_in = x
    else:
        x_in = jnp.zeros((m_pad, in_dim), x.dtype).at[:batch].set(x)

    # BlockSpecs: batch-tiled activations, whole (grid-invariant) weights/biases.
    in_specs = [pl.BlockSpec((tm, pdims[0]), lambda i: (i, 0))]
    flat_params = []
    for l in range(num_layers):
        kp, np_ = pdims[l], pdims[l + 1]
        in_specs.append(pl.BlockSpec((kp, np_), lambda i: (0, 0)))
        in_specs.append(pl.BlockSpec((1, np_), lambda i: (0, 0)))
        flat_params += [weights[l], biases[l]]
    out_spec = pl.BlockSpec((tm, pdims[-1]), lambda i: (i, 0))

    # VMEM budget: resident params (worst case double-buffered) + x/out tiles,
    # capped below v7x's 64 MiB physical VMEM.
    w_bytes = sum(w.size * w.dtype.itemsize for w in weights)
    b_bytes = sum(b.size * b.dtype.itemsize for b in biases)
    io_bytes = 4 * tm * (pdims[0] + pdims[-1])
    vmem_needed = 2 * (w_bytes + b_bytes + io_bytes)
    vmem_limit = int(min(max(vmem_needed + (4 << 20), 16 << 20), 48 << 20))

    # Advisory cost estimate for XLA scheduling around the custom call.
    flops = sum(2 * m_pad * kp * np_ for kp, np_ in zip(pdims[:-1], pdims[1:]))
    bytes_accessed = (4 * m_pad * pdims[0] + 4 * m_pad * pdims[-1]
                      + w_bytes + b_bytes)

    kernel = functools.partial(_fused_mlp_kernel, num_layers=num_layers)
    out_padded = pl.pallas_call(
        kernel,
        out_shape=jax.ShapeDtypeStruct((m_pad, pdims[-1]), jnp.float32),
        grid=(m_pad // tm,),
        in_specs=in_specs,
        out_specs=out_spec,
        compiler_params=pltpu.CompilerParams(
            dimension_semantics=("parallel",),   # batch tiles shard across TCs
            vmem_limit_bytes=vmem_limit,
        ),
        cost_estimate=pl.CostEstimate(
            flops=flops, transcendentals=0, bytes_accessed=bytes_accessed),
    )(x_in, *flat_params)

    # Strip batch and feature padding.
    return out_padded[:batch, :dims[-1]]


def init_mynet_params(layers, key):
    """Deterministic init mimicking PyTorch nn.Linear defaults:
    W, b ~ U(-1/sqrt(fan_in), 1/sqrt(fan_in)).  W stored as (in, out)."""
    params = []
    for i in range(len(layers) - 1):
        fan_in, fan_out = layers[i], layers[i + 1]
        key, kw, kb = jax.random.split(key, 3)
        bound = 1.0 / jnp.sqrt(jnp.float32(fan_in))
        w = jax.random.uniform(kw, (fan_in, fan_out), jnp.float32,
                               minval=-bound, maxval=bound)
        b = jax.random.uniform(kb, (fan_out,), jnp.float32,
                               minval=-bound, maxval=bound)
        params.append((w, b))
    return params


def mynet_forward_ref(x, params):
    """Pure-JAX f32 reference (exact PyTorch-module semantics)."""
    n = len(params)
    for i, (w, b) in enumerate(params):
        x = x @ w + b
        if i < n - 1:
            x = jnp.maximum(x, 0.0)
    return x


def mynet_forward_ref_bf16(x, params):
    """Pure-JAX reference with the same bf16-at-the-MXU / f32-accumulate math
    as the kernel (tight correctness check for the bf16 path)."""
    n = len(params)
    h = x
    for i, (w, b) in enumerate(params):
        h = jnp.dot(h.astype(jnp.bfloat16), w.astype(jnp.bfloat16),
                    preferred_element_type=jnp.float32) + b
        if i < n - 1:
            h = jnp.maximum(h, 0.0)
    return h


if __name__ == "__main__":
    # Deterministic example: MyNet([32, 64, 64, 16]).  Batch 256 keeps shapes
    # small but still gives a 2-step parallel batch grid (both v7x TCs used).
    layers = [32, 64, 64, 16]
    batch = 256

    key = jax.random.PRNGKey(0)
    key, kx = jax.random.split(key)
    x = jax.random.normal(kx, (batch, layers[0]), jnp.float32)
    params = init_mynet_params(layers, key)

    prepared = prepare_params(params)        # one-time: pad + cast to bf16
    out = mynet_forward(x, prepared)
    out = jax.block_until_ready(out)

    assert out.shape == (batch, layers[-1])
    # Tight check vs. an identical-math (bf16 MXU inputs, f32 accum) reference.
    ref_bf16 = mynet_forward_ref_bf16(x, params)
    assert jnp.allclose(out, ref_bf16, atol=2e-3, rtol=2e-3)
    # Loose check vs. the pure-f32 PyTorch-semantics reference (bf16 rounding).
    ref_f32 = mynet_forward_ref(x, params)
    assert jnp.allclose(out, ref_f32, atol=1e-1, rtol=1e-1)

    print("KERNEL_OK")
</pallas_src>

<mosaic_0001>
module attributes {stable_mosaic.version = 11 : i64} {
  func.func @_fused_mlp_kernel(%arg0: i32, %arg1: memref<128x32xf32, #tpu.memory_space<vmem>>, %arg2: memref<32x128xbf16, #tpu.memory_space<vmem>>, %arg3: memref<1x128xf32, #tpu.memory_space<vmem>>, %arg4: memref<128x128xbf16, #tpu.memory_space<vmem>>, %arg5: memref<1x128xf32, #tpu.memory_space<vmem>>, %arg6: memref<128x128xbf16, #tpu.memory_space<vmem>>, %arg7: memref<1x128xf32, #tpu.memory_space<vmem>>, %arg8: memref<128x128xf32, #tpu.memory_space<vmem>>) attributes {dimension_semantics = [#tpu.dimension_semantics<parallel>], iteration_bounds = array<i64: 2>, scalar_prefetch = 0 : i64, scratch_operands = 0 : i64, tpu.core_type = #tpu.core_type<tc>, window_params = [{transform_indices = @transform_0, window_bounds = array<i64: 128, 32>}, {pipeline_mode = #tpu.pipeline_mode<synchronous>, transform_indices = @transform_1, window_bounds = array<i64: 32, 128>}, {pipeline_mode = #tpu.pipeline_mode<synchronous>, transform_indices = @transform_2, window_bounds = array<i64: 1, 128>}, {pipeline_mode = #tpu.pipeline_mode<synchronous>, transform_indices = @transform_3, window_bounds = array<i64: 128, 128>}, {pipeline_mode = #tpu.pipeline_mode<synchronous>, transform_indices = @transform_4, window_bounds = array<i64: 1, 128>}, {pipeline_mode = #tpu.pipeline_mode<synchronous>, transform_indices = @transform_5, window_bounds = array<i64: 128, 128>}, {pipeline_mode = #tpu.pipeline_mode<synchronous>, transform_indices = @transform_6, window_bounds = array<i64: 1, 128>}, {transform_indices = @transform_7, window_bounds = array<i64: 128, 128>}]} {
    %c0 = arith.constant 0 : index
    %c0_0 = arith.constant 0 : index
    %0 = vector.load %arg1[%c0, %c0_0] : memref<128x32xf32, #tpu.memory_space<vmem>>, vector<128x32xf32>
    %c0_1 = arith.constant 0 : index
    %c0_2 = arith.constant 0 : index
    %1 = vector.load %arg2[%c0_1, %c0_2] : memref<32x128xbf16, #tpu.memory_space<vmem>>, vector<32x128xbf16>
    %c0_3 = arith.constant 0 : index
    %c0_4 = arith.constant 0 : index
    %2 = vector.load %arg3[%c0_3, %c0_4] : memref<1x128xf32, #tpu.memory_space<vmem>>, vector<1x128xf32>
    %3 = arith.truncf %0 : vector<128x32xf32> to vector<128x32xbf16>
    %cst = arith.constant dense<0.000000e+00> : vector<128x128xf32>
    %4 = tpu.matmul %3, %1, %cst {dimension_numbers = #tpu.dot_dimension_numbers<[1], [0], [0], [1], [0, 0, 1, 1], [], []>} : vector<128x32xbf16>, vector<32x128xbf16>, vector<128x128xf32> -> vector<128x128xf32>
    %5 = vector.broadcast %2 : vector<1x128xf32> to vector<128x128xf32>
    %6 = arith.addf %4, %5 : vector<128x128xf32>
    %cst_5 = arith.constant 0.000000e+00 : f32
    %7 = vector.broadcast %cst_5 : f32 to vector<128x128xf32>
    %8 = arith.maximumf %6, %7 : vector<128x128xf32>
    %c0_6 = arith.constant 0 : index
    %c0_7 = arith.constant 0 : index
    %9 = vector.load %arg4[%c0_6, %c0_7] : memref<128x128xbf16, #tpu.memory_space<vmem>>, vector<128x128xbf16>
    %c0_8 = arith.constant 0 : index
    %c0_9 = arith.constant 0 : index
    %10 = vector.load %arg5[%c0_8, %c0_9] : memref<1x128xf32, #tpu.memory_space<vmem>>, vector<1x128xf32>
    %11 = arith.truncf %8 : vector<128x128xf32> to vector<128x128xbf16>
    %cst_10 = arith.constant dense<0.000000e+00> : vector<128x128xf32>
    %12 = tpu.matmul %11, %9, %cst_10 {dimension_numbers = #tpu.dot_dimension_numbers<[1], [0], [0], [1], [0, 0, 1, 1], [], []>} : vector<128x128xbf16>, vector<128x128xbf16>, vector<128x128xf32> -> vector<128x128xf32>
    %13 = vector.broadcast %10 : vector<1x128xf32> to vector<128x128xf32>
    %14 = arith.addf %12, %13 : vector<128x128xf32>
    %cst_11 = arith.constant 0.000000e+00 : f32
    %15 = vector.broadcast %cst_11 : f32 to vector<128x128xf32>
    %16 = arith.maximumf %14, %15 : vector<128x128xf32>
    %c0_12 = arith.constant 0 : index
    %c0_13 = arith.constant 0 : index
    %17 = vector.load %arg6[%c0_12, %c0_13] : memref<128x128xbf16, #tpu.memory_space<vmem>>, vector<128x128xbf16>
    %c0_14 = arith.constant 0 : index
    %c0_15 = arith.constant 0 : index
    %18 = vector.load %arg7[%c0_14, %c0_15] : memref<1x128xf32, #tpu.memory_space<vmem>>, vector<1x128xf32>
    %19 = arith.truncf %16 : vector<128x128xf32> to vector<128x128xbf16>
    %cst_16 = arith.constant dense<0.000000e+00> : vector<128x128xf32>
    %20 = tpu.matmul %19, %17, %cst_16 {dimension_numbers = #tpu.dot_dimension_numbers<[1], [0], [0], [1], [0, 0, 1, 1], [], []>} : vector<128x128xbf16>, vector<128x128xbf16>, vector<128x128xf32> -> vector<128x128xf32>
    %21 = vector.broadcast %18 : vector<1x128xf32> to vector<128x128xf32>
    %22 = arith.addf %20, %21 : vector<128x128xf32>
    %c0_17 = arith.constant 0 : index
    %c0_18 = arith.constant 0 : index
    %23 = vector.load %arg8[%c0_17, %c0_18] : memref<128x128xf32, #tpu.memory_space<vmem>>, vector<128x128xf32>
    tpu.vector_store %arg8[%c0_17, %c0_18], %22 {strides = array<i32>} : memref<128x128xf32, #tpu.memory_space<vmem>>, vector<128x128xf32>,
    return
  }
  func.func @transform_0(%arg0: i32) -> (i32, i32) {
    %c0_i32 = arith.constant 0 : i32
    %c0_i32_0 = arith.constant 0 : i32
    return %arg0, %c0_i32 : i32, i32
  }
  func.func @transform_1(%arg0: i32) -> (i32, i32) {
    %c0_i32 = arith.constant 0 : i32
    %c0_i32_0 = arith.constant 0 : i32
    %c0_i32_1 = arith.constant 0 : i32
    return %c0_i32, %c0_i32_0 : i32, i32
  }
  func.func @transform_2(%arg0: i32) -> (i32, i32) {
    %c0_i32 = arith.constant 0 : i32
    %c0_i32_0 = arith.constant 0 : i32
    %c0_i32_1 = arith.constant 0 : i32
    return %c0_i32, %c0_i32_0 : i32, i32
  }
  func.func @transform_3(%arg0: i32) -> (i32, i32) {
    %c0_i32 = arith.constant 0 : i32
    %c0_i32_0 = arith.constant 0 : i32
    %c0_i32_1 = arith.constant 0 : i32
    return %c0_i32, %c0_i32_0 : i32, i32
  }
  func.func @transform_4(%arg0: i32) -> (i32, i32) {
    %c0_i32 = arith.constant 0 : i32
    %c0_i32_0 = arith.constant 0 : i32
    %c0_i32_1 = arith.constant 0 : i32
    return %c0_i32, %c0_i32_0 : i32, i32
  }
  func.func @transform_5(%arg0: i32) -> (i32, i32) {
    %c0_i32 = arith.constant 0 : i32
    %c0_i32_0 = arith.constant 0 : i32
    %c0_i32_1 = arith.constant 0 : i32
    return %c0_i32, %c0_i32_0 : i32, i32
  }
  func.func @transform_6(%arg0: i32) -> (i32, i32) {
    %c0_i32 = arith.constant 0 : i32
    %c0_i32_0 = arith.constant 0 : i32
    %c0_i32_1 = arith.constant 0 : i32
    return %c0_i32, %c0_i32_0 : i32, i32
  }
  func.func @transform_7(%arg0: i32) -> (i32, i32) {
    %c0_i32 = arith.constant 0 : i32
    %c0_i32_0 = arith.constant 0 : i32
    return %arg0, %c0_i32 : i32, i32
  }
}

</mosaic_0001>

<bundles_post_ra>
// kernel: tpu_custom_call.1
= control target key start
LH: loop header
LB: loop body
LE: loop exit
PB: predicated region body
PF: predicated region fallthrough
CT: control target
= control target key end

     0   :  { %12 = vsyncpa [#allocation3], 0  ;;  %s1471_s0 = inlined_call_operand.vmem [shape: f32[256,32], index: 0, kind: input, shape index: {}]   ;;  %s1472_s1 = inlined_call_operand.vmem [shape: bf16[32,128], index: 1, kind: input, shape index: {}]   ;;  %s1473_s2 = inlined_call_operand.vmem [shape: f32[1,128], index: 2, kind: input, shape index: {}]   ;;  %s1474_s3 = inlined_call_operand.vmem [shape: bf16[128,128], index: 3, kind: input, shape index: {}]   ;;  %s1475_s4 = inlined_call_operand.vmem [shape: f32[1,128], index: 4, kind: input, shape index: {}]   ;;  %s1476_s5 = inlined_call_operand.vmem [shape: bf16[128,128], index: 5, kind: input, shape index: {}]   ;;  %s1477_s6 = inlined_call_operand.vmem [shape: f32[1,128], index: 6, kind: input, shape index: {}]   ;;  %s1478_s7 = inlined_call_operand.hbm [shape: f32[256,128], index: 7, kind: output, shape index: {}]  }
   0x1   :  { %14 = vsyncpa [#allocation3 + $0x1], 0  ;;  %s1258_s24 = smov 0   ;;  %s1260_s25 = smov 0  }
   0x2   :  { %s1262_s26 = smov 0   ;;  %s1264_s27 = smov 0  }
   0x3 LB: > { %s1279_s28 = sadd.s32 4294967295, %s1213_s27   ;;  %s926_s29 = sadd.s32 4294967294, %s1213_s27   ;;  %s1213_s27 = sphi %s1264_s27, %s1484_s27   ;;  %s1209_s26 = sphi %s1262_s26, %s1483_s26   ;;  %s1205_s25 = sphi %s1260_s25, %s1482_s25   ;;  %s1201_s24 = sphi %s1258_s24, %s1481_s24  }
   0x4   : > { %s1283_s30 = sadd.s32 1, %s1213_s27   ;;  %s179_s8 = sadd.s32 1, %s1209_s26 }
   0x5   : > { %s176_s9 = ssub.s32 %s1213_s27, %s1283_s30  ;;  %p189_p0 = scmp.ne.s32.totalorder %s1209_s26, %s1205_s25 }
   0x6   : > { %p177_p1 = scmp.eq.s32.totalorder %s176_s9, 0  ;;  %p190_p2 = scmp.eq.s32.totalorder %s1279_s28, 1 }
   0x7   : > { %p195_p3 = scmp.ne.s32.totalorder %s1205_s25, %s1201_s24  ;;  %p196_p4 = scmp.eq.s32.totalorder %s926_s29, 1 }
   0x8   : > { %s1294_s10 = scalar_select %p177_p1, %s1209_s26, %s179_s8  }
   0x9   : > { %p1296_p5 = por %p190_p2, %p189_p0  ;;  %p1300_p6 = por %p196_p4, %p195_p3 }
   0xa   : > { %p929_p7 = scmp.ge.s32.totalorder %s1213_s27, 1  ;;  %p241_p8 = scmp.lt.s32.totalorder %s1213_s27, 3 }
   0xc   : > { %p242_p9 = pnand %p929_p7, %p241_p8 }
   0xd   : > { %s931_s15 = sshll.u32 (!%p242_p9), %s1279_s28, 4  ;;  %s270_s16 = sand.u32 (!%p242_p9), 1, %s1205_s25  }
   0xe   : > { %245 = sbr.rel (%p242_p9) target bundleno = 679 (0x2a7), region = 48  ;;  %p274_p10 = scmp.lt.s32.totalorder (!%p242_p9), %s931_s15, 31 }
   0xf   : > { %s930_s17 = sshll.u32 (!%p242_p9), %s270_s16, 7  ;;  %s967_s21 = sshll.u32 (!%p242_p9), %s1279_s28, 11 }
  0x10   : > { %s1402_s20 = scalar_lea.vmem (!%p242_p9), [#allocation2], %s930_s17  ;;  %s1431_s28 = scalar_lea.sflag (!%p242_p9), [#allocation3], %s270_s16 }
  0x11   : > { %s1215_s13 = smov (!%p242_p9), [#allocation2]  }
  0x12   : > { %s1157_s14 = sshll.u32 (!%p242_p9), %s1215_s13, 4  ;;  %s1158_s14 = int_to_ptr.vmem [resolvable:$false] %s1157_s14 }
  0x13   : > { %v1135_v0 = vld [vmem:[%s1472_s1 + $0x8] sm:$0xff]   ;;  %v1136_v1 = vld [vmem:[%s1472_s1] sm:$0xff]   ;;  %v1137_v2 = vld [vmem:[%s1474_s3 + $0x38] sm:$0xff]   ;;  %s1486_s15 = smov (!%p274_p10, %s931_s15), 31  ;;  %vm328_vm0 = vcmask 261120  }
  0x14   : > { %1010 = vmatprep.subr.bf16.mxu0 %v1135_v0  ;;  %v1138_v3 = vld [vmem:[%s1474_s3 + $0x30] sm:$0xff]   ;;  %1030 = vmatprep.subr.bf16.mxu1 %v1137_v2  ;;  %s932_s22 = sshll.u32 %s1486_s15, 3  ;;  %v1139_v4 = vld [vmem:[%s1474_s3 + $0x28] sm:$0xff]   ;;  %v1140_v14 = vld [vmem:[%s1474_s3 + $0x20] sm:$0xff]   ;;  %s1159_s15 = scalar_lea.vmem %s1158_s14, 4096 }
  0x15   : > { %1011 = vmatpush3.bf16.msra.mxu0 %v1135_v0  ;;  %1031 = vmatpush3.bf16.msra.mxu1 %v1137_v2  ;;  %s1322_s8 = scalar_lea.vmem %s1471_s0, %s932_s22  ;;  %v1141_v19 = vld [vmem:[%s1474_s3 + $0x18] sm:$0xff]   ;;  %v1142_v31 = vld [vmem:[%s1474_s3 + $0x10] sm:$0xff]   ;;  %v1143_v32 = vld [vmem:[%s1474_s3 + $0x8] sm:$0xff]   ;;  %s864_s22 = sshll.u32 %s1402_s20, 4  ;;  %s1425_s22 = int_to_ptr.vmem [resolvable:$true] %s864_s22 }
  0x16   : > { %1012 = vmatprep.subr.bf16.mxu0 %v1136_v1  ;;  %1032 = vmatprep.subr.bf16.mxu1 %v1138_v3  ;;  %v281_v5 = vld [vmem:[%s1322_s8] sm:$0xff]  ;;  %v282_v6 = vld [vmem:[%s1322_s8 + $0x8] sm:$0xff]  ;;  %v283_v7 = vld [vmem:[%s1322_s8 + $0x10] sm:$0xff]  ;;  %s1153_s9 = scalar_lea.vmem %s1425_s22, 2048  ;;  %p1160_p0 = scmp.lt.s32.totalorder %s1425_s22, %s1158_s14 }
  0x17   : > { %v302_v8 = vpack.c.bf16 %v282_v6, %v281_v5  ;;  %v284_v9 = vld [vmem:[%s1322_s8 + $0x18] sm:$0xff]  ;;  %v285_v10 = vld [vmem:[%s1322_s8 + $0x20] sm:$0xff]  ;;  %v286_v11 = vld [vmem:[%s1322_s8 + $0x28] sm:$0xff]  ;;  %p1154_p11 = scmp.ne.s32.totalorder %s1425_s22, %s1153_s9  ;;  %p1161_p1 = scmp.lt.s32.totalorder %s1159_s15, %s1153_s9 }
  0x18   : > { %v303_v12 = vpack.c.bf16 %v284_v9, %v283_v7  ;;  %v304_v13 = vpack.c.bf16 %v286_v11, %v285_v10  ;;  %v287_v15 = vld [vmem:[%s1322_s8 + $0x30] sm:$0xff]  ;;  %v288_v16 = vld [vmem:[%s1322_s8 + $0x38] sm:$0xff]  ;;  %v289_v17 = vld [vmem:[%s1322_s8 + $0x40] sm:$0xff] }
  0x19   : > { %1013 = vmatpush3.bf16.msra.mxu0 %v1136_v1  ;;  %1033 = vmatpush3.bf16.msra.mxu1 %v1138_v3  ;;  %v290_v18 = vld [vmem:[%s1322_s8 + $0x48] sm:$0xff]  ;;  %v305_v20 = vpack.c.bf16 %v288_v16, %v287_v15  ;;  %v291_v22 = vld [vmem:[%s1322_s8 + $0x50] sm:$0xff]  ;;  %v292_v23 = vld [vmem:[%s1322_s8 + $0x58] sm:$0xff]  ;;  %p1155_p12 = pnand %p1154_p11, %p1296_p5  ;;  %p1162_p2 = por %p1161_p1, %p1160_p0 }
  0x1a   : > { %1014 = vmatprep.mubr.msk.bf16.mxu0 %vm328_vm0, %v302_v8  ;;  %1034 = vmatprep.subr.bf16.mxu1 %v1139_v4  ;;  %v306_v21 = vpack.c.bf16 %v290_v18, %v289_v17  ;;  %v293_v24 = vld [vmem:[%s1322_s8 + $0x60] sm:$0xff]  ;;  %v294_v25 = vld [vmem:[%s1322_s8 + $0x68] sm:$0xff]  ;;  %v307_v26 = vpack.c.bf16 %v292_v23, %v291_v22  ;;  %v295_v28 = vld [vmem:[%s1322_s8 + $0x70] sm:$0xff] }
  0x1b   : > { %v308_v27 = vpack.c.bf16 %v294_v25, %v293_v24  ;;  %v296_v29 = vld [vmem:[%s1322_s8 + $0x78] sm:$0xff]  ;;  %v1144_v33 = vld [vmem:[%s1474_s3] sm:$0xff]   ;;  %v1146_v35 = vld [vmem:[%s1476_s5 + $0x30] sm:$0xff]   ;;  %s1423_s8 = scalar_lea.hbm %s1478_s7, %s967_s21  ;;  %p1156_p13 = pneg %p1155_p12 }
  0x1c   : > { %1015 = vmatmul.mubr.msk.bf16.vlgmr.msra.gmra.mxu0 %vm328_vm0, %v303_v12  ;;  %v309_v30 = vpack.c.bf16 %v296_v29, %v295_v28  ;;  %v1145_v34 = vld [vmem:[%s1476_s5 + $0x38] sm:$0xff]   ;;  %v1147_v36 = vld [vmem:[%s1476_s5 + $0x28] sm:$0xff]   ;;  %v1148_v37 = vld [vmem:[%s1476_s5 + $0x20] sm:$0xff]  }
  0x1d   : > { %1018 = vmatprep.mubr.msk.bf16.mxu0 %vm328_vm0, %v304_v13  ;;  %1035 = vmatpush3.bf16.msra.mxu1 %v1139_v4  ;;  %v1149_v38 = vld [vmem:[%s1476_s5 + $0x18] sm:$0xff]   ;;  %v933_v41 = vld [vmem:[%s1473_s2] ss:$0 sm:$0xff]  ;;  %p1163_p3 = pnand %p1162_p2, %p1156_p13 }
  0x1e   : > { %1036 = vmatprep.subr.bf16.mxu1 %v1140_v14  ;;  %1062 = vmatprep.subr.bf16.mxu0 %v1145_v34 }
  0x1f   : > { %1063 = vmatpush3.bf16.msra.mxu0 %v1145_v34  ;;  %v1152_v34 = vld [vmem:[%s1476_s5] sm:$0xff]  }
  0x20   : > { %1064 = vmatprep.subr.bf16.mxu0 %v1146_v35 }
  0x21   : > { %1037 = vmatpush3.bf16.msra.mxu1 %v1140_v14 }
  0x22   : > { %1038 = vmatprep.subr.bf16.mxu1 %v1141_v19 }
  0x23   : > { %1065 = vmatpush3.bf16.msra.mxu0 %v1146_v35 }
  0x24   : > { %1019 = vmatmul.mubr.msk.bf16.gmra.mxu0 %vm328_vm0, %v305_v20  ;;  %1066 = vmatprep.subr.bf16.mxu0 %v1147_v36 }
  0x25   : > { %1022 = vmatprep.mubr.msk.bf16.mxu0 %vm328_vm0, %v306_v21  ;;  %1039 = vmatpush3.bf16.msra.mxu1 %v1141_v19 }
  0x26   : > { %1040 = vmatprep.subr.bf16.mxu1 %v1142_v31 }
  0x27   : > { %1067 = vmatpush3.bf16.msra.mxu0 %v1147_v36 }
  0x28   : > { %1068 = vmatprep.subr.bf16.mxu0 %v1148_v37 }
  0x29   : > { %1041 = vmatpush3.bf16.msra.mxu1 %v1142_v31 }
  0x2a   : > { %1042 = vmatprep.subr.bf16.mxu1 %v1143_v32 }
  0x2b   : > { %1069 = vmatpush3.bf16.msra.mxu0 %v1148_v37  ;;  %v944_v37 = vld [vmem:[%s1475_s4] ss:$0 sm:$0xff] }
  0x2c   : > { %1023 = vmatmul.mubr.msk.bf16.gmra.mxu0 %vm328_vm0, %v307_v26  ;;  %1070 = vmatprep.subr.bf16.mxu0 %v1149_v38 }
  0x2d   : > { %1026 = vmatprep.mubr.msk.bf16.mxu0 %vm328_vm0, %v308_v27  ;;  %1043 = vmatpush3.bf16.msra.mxu1 %v1143_v32  ;;  %v1150_v32 = vld [vmem:[%s1476_s5 + $0x10] sm:$0xff]  }
  0x2e   : > { %1044 = vmatprep.subr.bf16.mxu1 %v1144_v33 }
  0x2f   : > { %1071 = vmatpush3.bf16.msra.mxu0 %v1149_v38 }
  0x30   : > { %1072 = vmatprep.subr.bf16.mxu0 %v1150_v32 }
  0x31   : > { %1045 = vmatpush3.bf16.msra.mxu1 %v1144_v33  ;;  %v1151_v33 = vld [vmem:[%s1476_s5 + $0x8] sm:$0xff]  }
  0x33   : > { %1073 = vmatpush3.bf16.msra.mxu0 %v1150_v32 }
  0x34   : > { %1027 = vmatmul.mubr.msk.bf16.gmra.mxu0 %vm328_vm0, %v309_v30  ;;  %1074 = vmatprep.subr.bf16.mxu0 %v1151_v33 }
  0x37   : > { %1075 = vmatpush3.bf16.msra.mxu0 %v1151_v33 }
  0x38   : > { %1076 = vmatprep.subr.bf16.mxu0 %v1152_v34 }
  0x3b   : > { %1077 = vmatpush3.bf16.msra.mxu0 %v1152_v34 }
  0xdc   : > { %v1016_v39 = vpop.f32.mrf.mxu0 }
  0xdd   : > { %v396_v45 = vadd.f32 %v1016_v39, %v933_v41 }
  0xde   : > { %v387_v40 = vpop.f32.mrf.mxu0 }
  0xdf   : > { %v388_v43 = vadd.f32 %v933_v41, %v387_v40  ;;  %v452_v52 = vmax.f32 %v396_v45, 0.0 }
  0xe0   : > { %v1017_v42 = vpop.f32.mrf.mxu0 }
  0xe1   : > { %v399_v44 = vadd.f32 %v1017_v42, %v933_v41  ;;  %v450_v50 = vmax.f32 %v388_v43, 0.0 }
  0xe2   : > { %v390_v46 = vpop.f32.mrf.mxu0 }
  0xe3   : > { %v391_v47 = vadd.f32 %v933_v41, %v390_v46  ;;  %v453_v48 = vmax.f32 %v399_v44, 0.0 }
  0xe4   : > { %v1020_v49 = vpop.f32.mrf.mxu0 }
  0xe5   : > { %v451_v51 = vmax.f32 %v391_v47, 0.0  ;;  %v484_v55 = vpack.c.bf16 %v453_v48, %v452_v52  ;;  %v412_v59 = vadd.f32 %v1020_v49, %v933_v41 }
  0xe6   : > { %v403_v53 = vpop.f32.mrf.mxu0 }
  0xe7   : > { %v483_v54 = vpack.c.bf16 %v451_v51, %v450_v50  ;;  %v404_v57 = vadd.f32 %v933_v41, %v403_v53  ;;  %v456_v2 = vmax.f32 %v412_v59, 0.0 }
  0xe8   : > { %v1021_v56 = vpop.f32.mrf.mxu0 }
  0xe9   : > { %v415_v58 = vadd.f32 %v1021_v56, %v933_v41  ;;  %1046 = vmatprep.mubr.bf16.mxu1 %v483_v54  ;;  %v454_v0 = vmax.f32 %v404_v57, 0.0 }
  0xea   : > { %v406_v60 = vpop.f32.mrf.mxu0  ;;  %1047 = vmatmul.mubr.bf16.vlgmr.msra.gmra.mxu1 %v484_v55 }
  0xeb   : > { %v407_v61 = vadd.f32 %v933_v41, %v406_v60  ;;  %v457_v62 = vmax.f32 %v415_v58, 0.0 }
  0xec   : > { %v1024_v63 = vpop.f32.mrf.mxu0 }
  0xed   : > { %v455_v1 = vmax.f32 %v407_v61, 0.0  ;;  %v486_v5 = vpack.c.bf16 %v457_v62, %v456_v2  ;;  %v428_v9 = vadd.f32 %v1024_v63, %v933_v41 }
  0xee   : > { %v419_v3 = vpop.f32.mrf.mxu0 }
  0xef   : > { %v485_v4 = vpack.c.bf16 %v455_v1, %v454_v0  ;;  %v420_v7 = vadd.f32 %v933_v41, %v419_v3  ;;  %v460_v16 = vmax.f32 %v428_v9, 0.0 }
  0xf0   : > { %v1025_v6 = vpop.f32.mrf.mxu0 }
  0xf1   : > { %v431_v8 = vadd.f32 %v1025_v6, %v933_v41  ;;  %1050 = vmatprep.mubr.bf16.mxu1 %v485_v4  ;;  %v458_v14 = vmax.f32 %v420_v7, 0.0 }
  0xf2   : > { %v422_v10 = vpop.f32.mrf.mxu0  ;;  %1051 = vmatmul.mubr.bf16.gmra.mxu1 %v486_v5 }
  0xf3   : > { %v423_v11 = vadd.f32 %v933_v41, %v422_v10  ;;  %v461_v12 = vmax.f32 %v431_v8, 0.0 }
  0xf4   : > { %v1028_v13 = vpop.f32.mrf.mxu0 }
  0xf5   : > { %v459_v15 = vmax.f32 %v423_v11, 0.0  ;;  %v488_v19 = vpack.c.bf16 %v461_v12, %v460_v16  ;;  %v444_v23 = vadd.f32 %v1028_v13, %v933_v41 }
  0xf6   : > { %v435_v17 = vpop.f32.mrf.mxu0 }
  0xf7   : > { %v487_v18 = vpack.c.bf16 %v459_v15, %v458_v14  ;;  %v436_v21 = vadd.f32 %v933_v41, %v435_v17  ;;  %v464_v29 = vmax.f32 %v444_v23, 0.0 }
  0xf8   : > { %v1029_v20 = vpop.f32.mrf.mxu0 }
  0xf9   : > { %v447_v22 = vadd.f32 %v1029_v20, %v933_v41  ;;  %1054 = vmatprep.mubr.bf16.mxu1 %v487_v18  ;;  %v462_v27 = vmax.f32 %v436_v21, 0.0 }
  0xfa   : > { %v438_v24 = vpop.f32.mrf.mxu0  ;;  %1055 = vmatmul.mubr.bf16.gmra.mxu1 %v488_v19 }
  0xfb   : > { %v439_v25 = vadd.f32 %v933_v41, %v438_v24  ;;  %v465_v26 = vmax.f32 %v447_v22, 0.0 }
  0xfd   : > { %v463_v28 = vmax.f32 %v439_v25, 0.0  ;;  %v490_v31 = vpack.c.bf16 %v465_v26, %v464_v29 }
  0xff   : > { %v489_v30 = vpack.c.bf16 %v463_v28, %v462_v27  ;;  %v953_v28 = vld [vmem:[%s1477_s6] ss:$0 sm:$0xff] }
 0x101   : > { %1058 = vmatprep.mubr.bf16.mxu1 %v489_v30 }
 0x102   : > { %1059 = vmatmul.mubr.bf16.gmra.mxu1 %v490_v31 }
 0x1aa   : > { %v1048_v35 = vpop.f32.mrf.mxu1 }
 0x1ab   : > { %v588_v41 = vadd.f32 %v1048_v35, %v944_v37 }
 0x1ac   : > { %v579_v36 = vpop.f32.mrf.mxu1 }
 0x1ad   : > { %v580_v39 = vadd.f32 %v944_v37, %v579_v36  ;;  %v644_v48 = vmax.f32 %v588_v41, 0.0 }
 0x1ae   : > { %v1049_v38 = vpop.f32.mrf.mxu1 }
 0x1af   : > { %v591_v40 = vadd.f32 %v1049_v38, %v944_v37  ;;  %v642_v46 = vmax.f32 %v580_v39, 0.0 }
 0x1b0   : > { %v582_v42 = vpop.f32.mrf.mxu1 }
 0x1b1   : > { %v583_v43 = vadd.f32 %v944_v37, %v582_v42  ;;  %v645_v44 = vmax.f32 %v591_v40, 0.0 }
 0x1b2   : > { %v1052_v45 = vpop.f32.mrf.mxu1 }
 0x1b3   : > { %v643_v47 = vmax.f32 %v583_v43, 0.0  ;;  %v676_v51 = vpack.c.bf16 %v645_v44, %v644_v48  ;;  %v604_v55 = vadd.f32 %v1052_v45, %v944_v37 }
 0x1b4   : > { %v595_v49 = vpop.f32.mrf.mxu1 }
 0x1b5   : > { %v675_v50 = vpack.c.bf16 %v643_v47, %v642_v46  ;;  %v596_v53 = vadd.f32 %v944_v37, %v595_v49  ;;  %v648_v62 = vmax.f32 %v604_v55, 0.0 }
 0x1b6   : > { %v1053_v52 = vpop.f32.mrf.mxu1 }
 0x1b7   : > { %v607_v54 = vadd.f32 %v1053_v52, %v944_v37  ;;  %1078 = vmatprep.mubr.bf16.mxu0 %v675_v50  ;;  %v646_v60 = vmax.f32 %v596_v53, 0.0 }
 0x1b8   : > { %v598_v56 = vpop.f32.mrf.mxu1  ;;  %1079 = vmatmul.mubr.bf16.vlgmr.msra.gmra.mxu0 %v676_v51 }
 0x1b9   : > { %v599_v57 = vadd.f32 %v944_v37, %v598_v56  ;;  %v649_v58 = vmax.f32 %v607_v54, 0.0 }
 0x1ba   : > { %v1056_v59 = vpop.f32.mrf.mxu1 }
 0x1bb   : > { %v647_v61 = vmax.f32 %v599_v57, 0.0  ;;  %v678_v1 = vpack.c.bf16 %v649_v58, %v648_v62  ;;  %v620_v5 = vadd.f32 %v1056_v59, %v944_v37 }
 0x1bc   : > { %v611_v63 = vpop.f32.mrf.mxu1 }
 0x1bd   : > { %v677_v0 = vpack.c.bf16 %v647_v61, %v646_v60  ;;  %v612_v3 = vadd.f32 %v944_v37, %v611_v63  ;;  %v652_v12 = vmax.f32 %v620_v5, 0.0 }
 0x1be   : > { %v1057_v2 = vpop.f32.mrf.mxu1 }
 0x1bf   : > { %v623_v4 = vadd.f32 %v1057_v2, %v944_v37  ;;  %1082 = vmatprep.mubr.bf16.mxu0 %v677_v0  ;;  %v650_v10 = vmax.f32 %v612_v3, 0.0 }
 0x1c0   : > { %v614_v6 = vpop.f32.mrf.mxu1  ;;  %1083 = vmatmul.mubr.bf16.gmra.mxu0 %v678_v1 }
 0x1c1   : > { %v615_v7 = vadd.f32 %v944_v37, %v614_v6  ;;  %v653_v8 = vmax.f32 %v623_v4, 0.0 }
 0x1c2   : > { %v1060_v9 = vpop.f32.mrf.mxu1 }
 0x1c3   : > { %v651_v11 = vmax.f32 %v615_v7, 0.0  ;;  %v680_v15 = vpack.c.bf16 %v653_v8, %v652_v12  ;;  %v636_v19 = vadd.f32 %v1060_v9, %v944_v37 }
 0x1c4   : > { %v627_v13 = vpop.f32.mrf.mxu1 }
 0x1c5   : > { %v679_v14 = vpack.c.bf16 %v651_v11, %v650_v10  ;;  %v628_v17 = vadd.f32 %v944_v37, %v627_v13  ;;  %v656_v25 = vmax.f32 %v636_v19, 0.0 }
 0x1c6   : > { %v1061_v16 = vpop.f32.mrf.mxu1 }
 0x1c7   : > { %v639_v18 = vadd.f32 %v1061_v16, %v944_v37  ;;  %1086 = vmatprep.mubr.bf16.mxu0 %v679_v14  ;;  %v654_v23 = vmax.f32 %v628_v17, 0.0 }
 0x1c8   : > { %v630_v20 = vpop.f32.mrf.mxu1  ;;  %1087 = vmatmul.mubr.bf16.gmra.mxu0 %v680_v15 }
 0x1c9   : > { %v631_v21 = vadd.f32 %v944_v37, %v630_v20  ;;  %v657_v22 = vmax.f32 %v639_v18, 0.0 }
 0x1cb   : > { %v655_v24 = vmax.f32 %v631_v21, 0.0  ;;  %v682_v27 = vpack.c.bf16 %v657_v22, %v656_v25 }
 0x1cd   : > { %v681_v26 = vpack.c.bf16 %v655_v24, %v654_v23 }
 0x1cf   : > { %1090 = vmatprep.mubr.bf16.mxu0 %v681_v26 }
 0x1d0   : > { %1091 = vmatmul.mubr.bf16.gmra.mxu0 %v682_v27 }
 0x278   : > { %v1080_v29 = vpop.f32.mrf.mxu0 }
 0x279   : > { %v780_v30 = vadd.f32 %v1080_v29, %v953_v28 }
 0x27a   : > { %v771_v31 = vpop.f32.mrf.mxu0 }
 0x27b   : > { %836 = vst [vmem:[%s1402_s20 + $0x10] sm:$0xff] %v780_v30  ;;  %v772_v32 = vadd.f32 %v953_v28, %v771_v31 }
 0x27c   : > { %v1081_v33 = vpop.f32.mrf.mxu0 }
 0x27d   : > { %834 = vst [vmem:[%s1402_s20] sm:$0xff] %v772_v32  ;;  %v783_v34 = vadd.f32 %v1081_v33, %v953_v28 }
 0x27e   : > { %v774_v35 = vpop.f32.mrf.mxu0 }
 0x27f   : > { %837 = vst [vmem:[%s1402_s20 + $0x18] sm:$0xff] %v783_v34  ;;  %v775_v36 = vadd.f32 %v953_v28, %v774_v35 }
 0x280   : > { %v1084_v37 = vpop.f32.mrf.mxu0 }
 0x281   : > { %835 = vst [vmem:[%s1402_s20 + $0x8] sm:$0xff] %v775_v36  ;;  %v796_v38 = vadd.f32 %v1084_v37, %v953_v28 }
 0x282   : > { %v787_v39 = vpop.f32.mrf.mxu0 }
 0x283   : > { %840 = vst [vmem:[%s1402_s20 + $0x30] sm:$0xff] %v796_v38  ;;  %v788_v40 = vadd.f32 %v953_v28, %v787_v39 }
 0x284   : > { %v1085_v41 = vpop.f32.mrf.mxu0 }
 0x285   : > { %838 = vst [vmem:[%s1402_s20 + $0x20] sm:$0xff] %v788_v40  ;;  %v799_v42 = vadd.f32 %v1085_v41, %v953_v28 }
 0x286   : > { %v790_v43 = vpop.f32.mrf.mxu0 }
 0x287   : > { %841 = vst [vmem:[%s1402_s20 + $0x38] sm:$0xff] %v799_v42  ;;  %v791_v44 = vadd.f32 %v953_v28, %v790_v43 }
 0x288   : > { %v1088_v45 = vpop.f32.mrf.mxu0 }
 0x289   : > { %839 = vst [vmem:[%s1402_s20 + $0x28] sm:$0xff] %v791_v44  ;;  %v812_v46 = vadd.f32 %v1088_v45, %v953_v28 }
 0x28a   : > { %v803_v47 = vpop.f32.mrf.mxu0 }
 0x28b   : > { %844 = vst [vmem:[%s1402_s20 + $0x50] sm:$0xff] %v812_v46  ;;  %v804_v48 = vadd.f32 %v953_v28, %v803_v47 }
 0x28c   : > { %v1089_v49 = vpop.f32.mrf.mxu0 }
 0x28d   : > { %842 = vst [vmem:[%s1402_s20 + $0x40] sm:$0xff] %v804_v48  ;;  %v815_v50 = vadd.f32 %v1089_v49, %v953_v28 }
 0x28e   : > { %v806_v51 = vpop.f32.mrf.mxu0 }
 0x28f   : > { %845 = vst [vmem:[%s1402_s20 + $0x58] sm:$0xff] %v815_v50  ;;  %v807_v52 = vadd.f32 %v953_v28, %v806_v51 }
 0x290   : > { %v1092_v53 = vpop.f32.mrf.mxu0 }
 0x291   : > { %843 = vst [vmem:[%s1402_s20 + $0x48] sm:$0xff] %v807_v52  ;;  %v828_v54 = vadd.f32 %v1092_v53, %v953_v28 }
 0x292   : > { %v819_v55 = vpop.f32.mrf.mxu0 }
 0x293   : > { %848 = vst [vmem:[%s1402_s20 + $0x70] sm:$0xff] %v828_v54  ;;  %v820_v56 = vadd.f32 %v953_v28, %v819_v55 }
 0x294   : > { %v1093_v57 = vpop.f32.mrf.mxu0 }
 0x295   : > { %846 = vst [vmem:[%s1402_s20 + $0x60] sm:$0xff] %v820_v56  ;;  %v831_v58 = vadd.f32 %v1093_v57, %v953_v28 }
 0x296   : > { %v822_v59 = vpop.f32.mrf.mxu0 }
 0x297   : > { %849 = vst [vmem:[%s1402_s20 + $0x78] sm:$0xff] %v831_v58  ;;  %v823_v60 = vadd.f32 %v953_v28, %v822_v59 }
 0x299   : > { %847 = vst [vmem:[%s1402_s20 + $0x68] sm:$0xff] %v823_v60 }
 0x29a   : > { %1166 = shalt.err (!%p1163_p3)
}
 0x29b   : > { %s1167_s16 = scalar_lea.hbm %s1423_s8, 2048  ;;  %s1171_s19 = scalar_lea.hbm %s1478_s7, 4096 }
 0x29c   : > { %p1168_p4 = scmp.ne.s32.totalorder %s1423_s8, %s1167_s16  ;;  %p1172_p9 = scmp.lt.s32.totalorder %s1423_s8, %s1478_s7 }
 0x29d   : > { %p1173_p10 = scmp.lt.s32.totalorder %s1171_s19, %s1167_s16 }
 0x29e   : > { %p1169_p7 = pnand %p1168_p4, %p1296_p5 }
 0x29f   : > { %p1174_p11 = por %p1173_p10, %p1172_p9 }
 0x2a0   : > { %p1170_p8 = pneg %p1169_p7 }
 0x2a2   : > { %p1175_p12 = pnand %p1174_p11, %p1170_p8 }
 0x2a4   : > { %1178 = shalt.err (!%p1175_p12)
}
 0x2a5   : > { %s1216_s23 = smov 128   ;;  %s1217_s29 = smov 8  }
 0x2a6   : > { %1094 = dma.vmem_to_hbm [thread:$0]  (%p1296_p5), %s1425_s22, 2048, %s1423_s8, %s1431_s28, %s1216_s23, %s1216_s23, %s1217_s29  }
 0x2a7 PF: > { %p1100_p13 = scmp.ge.s32.totalorder %s1213_s27, 2  ;;  %s879_s9 = sand.u32 1, %s1201_s24  }
 0x2a8   : > { %s880_s13 = scalar_lea.sflag [#allocation3], %s879_s9 }
 0x2a9   : > { %p1097_p0 = pnand %p1100_p13, %p1300_p6 }
 0x2ab   : > { %p1098_p1 = pneg %p1097_p0 }
 0x2ad   : > { %1196 = dma.done.wait (%p1098_p1), %s880_s13, 2048  }
 0x2ae   : > { %1198 = vsyncadd (%p1098_p1), %s880_s13, 4294965248  ;;  %p17_p2 = scmp.ge.s32.totalorder %s1283_s30, 4   ;;  %s1481_s24 = smov %s1205_s25 }
 0x2af   : > { %s1482_s25 = smov %s1209_s26  ;;  %s1483_s26 = smov %s1294_s10 }
 0x2b0   : > { %s1484_s27 = smov %s1283_s30  ;;  %19 = sbr.rel (!%p17_p2) target bundleno = 3 (0x3), region = 83 }
 0x2b5   :  { %885 = vsyncpa [#allocation3], 1 }
 0x2b6   :  { %887 = vsyncpa [#allocation3 + $0x1], 1 }

</bundles_post_ra>
